<compile_context>
chip_gen: v7x
topology: tpu7x:2x2x1
jax: 0.10.0
libtpu: 0.0.40
codegen_flags: <defaults>
</compile_context>

<pallas_src>
import jax
import jax.numpy as jnp
from jax.experimental import pallas as pl
from jax.experimental.pallas import tpu as pltpu


def _round_up(v: int, m: int) -> int:
    return ((v + m - 1) // m) * m


def _make_lstm_kernel(num_layers: int, hidden: int, in_dims):
    """Fused forward: (fc_in folded into layer 0) -> L single-step LSTM cells -> fc_out."""
    H = hidden

    def kernel(x_ref, w_slab_ref, b_ref, w_out_ref, b_out_ref, o_ref):
        act = x_ref[...]                                   # (tb, F_in) bf16
        row = 0
        for l in range(num_layers):
            rows = in_dims[l]
            w = w_slab_ref[row:row + rows, :]              # (rows, 4H) bf16, static slice
            row += rows
            b = b_ref[l:l + 1, :]                          # (1, 4H) f32

            # Zero initial state (reset_hidden_states) => h_prev = c_prev = 0:
            # the h_prev @ W_hh term vanishes and c_new = i * g (forget gate dead).
            gates = (jnp.dot(act, w, preferred_element_type=jnp.float32)
                     + b)                                  # (tb, 4H)  PyTorch order i,f,g,o

            # Full-vreg nonlinearity over the 4H = 128 lane axis: one wide tanh
            # yields both sigmoid gates (sigmoid(x) == 0.5 * (tanh(x/2) + 1)).
            sig = 0.5 * (jnp.tanh(0.5 * gates) + 1.0)
            i_g = sig[:, 0 * H:1 * H]
            o_g = sig[:, 3 * H:4 * H]
            g_g = jnp.tanh(gates[:, 2 * H:3 * H])

            c_new = i_g * g_g
            act = (o_g * jnp.tanh(c_new)).astype(jnp.bfloat16)   # next layer's MXU input

        # fc_out:  (tb, H) @ (H, F_out) + (1, F_out)
        out = (jnp.dot(act, w_out_ref[...], preferred_element_type=jnp.float32)
               + b_out_ref[...])
        o_ref[...] = out.astype(o_ref.dtype)

    return kernel


def custom_lstm_forward(x, params, *, num_layers: int, hidden: int):
    """x: (B, fc_input_size) float32. Returns (B, fc_output_size) float32."""
    B, f_in = x.shape
    f_out = params["fc_out_w"].shape[0]
    H = hidden

    # --- Fold fc_in into layer 0 (both are purely linear into the gate matmul). ---
    w_in_t = params["fc_in_w"].T.astype(jnp.float32)            # (F_in, D_in)
    b_in = params["fc_in_b"].astype(jnp.float32)                # (D_in,)
    w_ih0_t = params["w_ih_0"].T.astype(jnp.float32)            # (D_in, 4H)
    w0 = w_in_t @ w_ih0_t                                       # (F_in, 4H)
    b0 = (b_in[None, :] @ w_ih0_t
          + (params["b_ih_0"] + params["b_hh_0"])[None, :])     # (1, 4H)

    # --- Pack per-layer gate weights / biases into two slabs. ---
    w_chunks = [w0]
    b_rows = [b0]
    in_dims = [f_in]
    for l in range(1, num_layers):
        w_chunks.append(params[f"w_ih_{l}"].T)                  # (H, 4H)
        b_rows.append((params[f"b_ih_{l}"] + params[f"b_hh_{l}"])[None, :])
        in_dims.append(H)
    w_slab = jnp.concatenate(w_chunks, axis=0).astype(jnp.bfloat16)   # (F_in+(L-1)H, 4H)
    b_slab = jnp.concatenate(b_rows, axis=0).astype(jnp.float32)      # (L, 4H)
    w_out_t = params["fc_out_w"].T.astype(jnp.bfloat16)               # (H, F_out)
    b_out = params["fc_out_b"][None, :].astype(jnp.float32)           # (1, F_out)

    # bf16 MXU operand for the batch stream (halves the dominant HBM bytes).
    x_bf = x.astype(jnp.bfloat16)

    # --- Batch row tile: >=2 grid steps when B allows (both TCs on v7x), <=256 rows
    #     (single vst slot on v5e), sublane/bf16-packing friendly (multiple of 16). ---
    if B <= 16:
        tb = B
    else:
        tb = min(256, _round_up(pl.cdiv(B, 2), 16))
    grid = (pl.cdiv(B, tb),)

    const_inputs = [w_slab, b_slab, w_out_t, b_out]
    in_specs = [pl.BlockSpec((tb, f_in), lambda i: (i, 0))]
    # Constant block index -> weights stay resident in VMEM across grid steps.
    in_specs += [pl.BlockSpec(a.shape, lambda i: (0, 0)) for a in const_inputs]
    out_specs = pl.BlockSpec((tb, f_out), lambda i: (i, 0))

    # Advisory cost estimate (tiny latency-bound op; helps XLA schedule it).
    flops = 2 * B * f_in * 4 * H + 2 * B * H * f_out
    for l in range(1, num_layers):
        flops += 2 * B * H * 4 * H
    transcendentals = B * num_layers * 6 * H
    bytes_accessed = (2 * x.size
                      + sum(int(a.size) * a.dtype.itemsize for a in const_inputs)
                      + 4 * B * f_out)

    kernel = _make_lstm_kernel(num_layers, H, tuple(in_dims))

    return pl.pallas_call(
        kernel,
        out_shape=jax.ShapeDtypeStruct((B, f_out), jnp.float32),
        grid_spec=pl.GridSpec(grid=grid, in_specs=in_specs, out_specs=out_specs),
        compiler_params=pltpu.CompilerParams(dimension_semantics=("parallel",)),
        cost_estimate=pl.CostEstimate(flops=flops,
                                      transcendentals=transcendentals,
                                      bytes_accessed=bytes_accessed),
    )(x_bf, *const_inputs)


def custom_lstm_ref(x, params, *, num_layers: int, hidden: int):
    """Pure-JAX f32 reference with PyTorch nn.LSTM semantics (seq_len=1, zero state)."""
    B = x.shape[0]
    act = x @ params["fc_in_w"].T + params["fc_in_b"]
    for l in range(num_layers):
        w_ih = params[f"w_ih_{l}"]
        w_hh = params[f"w_hh_{l}"]
        b_ih = params[f"b_ih_{l}"]
        b_hh = params[f"b_hh_{l}"]
        h_prev = jnp.zeros((B, hidden), jnp.float32)
        c_prev = jnp.zeros((B, hidden), jnp.float32)
        gates = act @ w_ih.T + b_ih + h_prev @ w_hh.T + b_hh
        i = jax.nn.sigmoid(gates[:, 0 * hidden:1 * hidden])
        f = jax.nn.sigmoid(gates[:, 1 * hidden:2 * hidden])
        g = jnp.tanh(gates[:, 2 * hidden:3 * hidden])
        o = jax.nn.sigmoid(gates[:, 3 * hidden:4 * hidden])
        c = f * c_prev + i * g
        act = o * jnp.tanh(c)
    return act @ params["fc_out_w"].T + params["fc_out_b"]


if __name__ == "__main__":
    # Small config consistent with the module:
    #   IN_DIM=16 (fc_input_size), input_size=32, hidden_size=32, num_layers=2,
    #   OUT_DIM=8 (fc_output_size), batch=2 (seq_len is implicitly 1).
    B, F_IN, D_IN, H, L, F_OUT = 2, 16, 32, 32, 2, 8

    key = jax.random.PRNGKey(0)
    keys = jax.random.split(key, 4 * L + 5)
    scale = 0.1
    params = {
        "fc_in_w": scale * jax.random.normal(keys[0], (D_IN, F_IN), jnp.float32),
        "fc_in_b": scale * jax.random.normal(keys[1], (D_IN,), jnp.float32),
        "fc_out_w": scale * jax.random.normal(keys[2], (F_OUT, H), jnp.float32),
        "fc_out_b": scale * jax.random.normal(keys[3], (F_OUT,), jnp.float32),
    }
    for l in range(L):
        in_l = D_IN if l == 0 else H
        params[f"w_ih_{l}"] = scale * jax.random.normal(keys[4 + 4 * l + 0], (4 * H, in_l), jnp.float32)
        params[f"w_hh_{l}"] = scale * jax.random.normal(keys[4 + 4 * l + 1], (4 * H, H), jnp.float32)
        params[f"b_ih_{l}"] = scale * jax.random.normal(keys[4 + 4 * l + 2], (4 * H,), jnp.float32)
        params[f"b_hh_{l}"] = scale * jax.random.normal(keys[4 + 4 * l + 3], (4 * H,), jnp.float32)

    x = jax.random.normal(keys[-1], (B, F_IN), jnp.float32)

    out = custom_lstm_forward(x, params, num_layers=L, hidden=H)
    out = jax.block_until_ready(out)

    ref = custom_lstm_ref(x, params, num_layers=L, hidden=H)
    assert out.shape == (B, F_OUT)
    # bf16 MXU operands + fc_in folding -> loosened tolerance vs the f32 reference.
    assert jnp.allclose(out, ref, atol=2e-2, rtol=2e-2), "mismatch vs reference"

    print("KERNEL_OK")
</pallas_src>

<mosaic_0001>
module attributes {stable_mosaic.version = 11 : i64} {
  func.func @kernel(%arg0: i32, %arg1: memref<2x16xbf16, #tpu.memory_space<vmem>>, %arg2: memref<48x128xbf16, #tpu.memory_space<vmem>>, %arg3: memref<2x128xf32, #tpu.memory_space<vmem>>, %arg4: memref<32x8xbf16, #tpu.memory_space<vmem>>, %arg5: memref<1x8xf32, #tpu.memory_space<vmem>>, %arg6: memref<2x8xf32, #tpu.memory_space<vmem>>) attributes {dimension_semantics = [#tpu.dimension_semantics<parallel>], iteration_bounds = array<i64: 1>, scalar_prefetch = 0 : i64, scratch_operands = 0 : i64, tpu.core_type = #tpu.core_type<tc>, window_params = [{transform_indices = @transform_0, window_bounds = array<i64: 2, 16>}, {pipeline_mode = #tpu.pipeline_mode<synchronous>, transform_indices = @transform_1, window_bounds = array<i64: 48, 128>}, {pipeline_mode = #tpu.pipeline_mode<synchronous>, transform_indices = @transform_2, window_bounds = array<i64: 2, 128>}, {pipeline_mode = #tpu.pipeline_mode<synchronous>, transform_indices = @transform_3, window_bounds = array<i64: 32, 8>}, {pipeline_mode = #tpu.pipeline_mode<synchronous>, transform_indices = @transform_4, window_bounds = array<i64: 1, 8>}, {transform_indices = @transform_5, window_bounds = array<i64: 2, 8>}]} {
    %c0 = arith.constant 0 : index
    %c0_0 = arith.constant 0 : index
    %0 = vector.load %arg1[%c0, %c0_0] : memref<2x16xbf16, #tpu.memory_space<vmem>>, vector<2x16xbf16>
    %c0_1 = arith.constant 0 : index
    %c0_2 = arith.constant 0 : index
    %1 = vector.load %arg2[%c0_1, %c0_2] : memref<48x128xbf16, #tpu.memory_space<vmem>>, vector<16x128xbf16>
    %c0_3 = arith.constant 0 : index
    %c0_4 = arith.constant 0 : index
    %2 = vector.load %arg3[%c0_3, %c0_4] : memref<2x128xf32, #tpu.memory_space<vmem>>, vector<1x128xf32>
    %cst = arith.constant dense<0.000000e+00> : vector<2x128xf32>
    %3 = tpu.matmul %0, %1, %cst {dimension_numbers = #tpu.dot_dimension_numbers<[1], [0], [0], [1], [0, 0, 1, 1], [], []>} : vector<2x16xbf16>, vector<16x128xbf16>, vector<2x128xf32> -> vector<2x128xf32>
    %4 = vector.broadcast %2 : vector<1x128xf32> to vector<2x128xf32>
    %5 = arith.addf %3, %4 : vector<2x128xf32>
    %cst_5 = arith.constant 5.000000e-01 : f32
    %6 = vector.broadcast %cst_5 : f32 to vector<2x128xf32>
    %7 = arith.mulf %6, %5 : vector<2x128xf32>
    %8 = math.tanh %7 : vector<2x128xf32>
    %cst_6 = arith.constant 1.000000e+00 : f32
    %9 = vector.broadcast %cst_6 : f32 to vector<2x128xf32>
    %10 = arith.addf %8, %9 : vector<2x128xf32>
    %cst_7 = arith.constant 5.000000e-01 : f32
    %11 = vector.broadcast %cst_7 : f32 to vector<2x128xf32>
    %12 = arith.mulf %11, %10 : vector<2x128xf32>
    %13 = vector.extract_strided_slice %12 {offsets = [0, 0], sizes = [2, 32], strides = [1, 1]} : vector<2x128xf32> to vector<2x32xf32>
    %14 = vector.extract_strided_slice %12 {offsets = [0, 96], sizes = [2, 32], strides = [1, 1]} : vector<2x128xf32> to vector<2x32xf32>
    %15 = vector.extract_strided_slice %5 {offsets = [0, 64], sizes = [2, 32], strides = [1, 1]} : vector<2x128xf32> to vector<2x32xf32>
    %16 = math.tanh %15 : vector<2x32xf32>
    %17 = arith.mulf %13, %16 : vector<2x32xf32>
    %18 = math.tanh %17 : vector<2x32xf32>
    %19 = arith.mulf %14, %18 : vector<2x32xf32>
    %20 = arith.truncf %19 : vector<2x32xf32> to vector<2x32xbf16>
    %c16 = arith.constant 16 : index
    %c0_8 = arith.constant 0 : index
    %21 = vector.load %arg2[%c16, %c0_8] : memref<48x128xbf16, #tpu.memory_space<vmem>>, vector<32x128xbf16>
    %c1 = arith.constant 1 : index
    %c0_9 = arith.constant 0 : index
    %22 = vector.load %arg3[%c1, %c0_9] : memref<2x128xf32, #tpu.memory_space<vmem>>, vector<1x128xf32>
    %cst_10 = arith.constant dense<0.000000e+00> : vector<2x128xf32>
    %23 = tpu.matmul %20, %21, %cst_10 {dimension_numbers = #tpu.dot_dimension_numbers<[1], [0], [0], [1], [0, 0, 1, 1], [], []>} : vector<2x32xbf16>, vector<32x128xbf16>, vector<2x128xf32> -> vector<2x128xf32>
    %24 = vector.broadcast %22 : vector<1x128xf32> to vector<2x128xf32>
    %25 = arith.addf %23, %24 : vector<2x128xf32>
    %cst_11 = arith.constant 5.000000e-01 : f32
    %26 = vector.broadcast %cst_11 : f32 to vector<2x128xf32>
    %27 = arith.mulf %26, %25 : vector<2x128xf32>
    %28 = math.tanh %27 : vector<2x128xf32>
    %cst_12 = arith.constant 1.000000e+00 : f32
    %29 = vector.broadcast %cst_12 : f32 to vector<2x128xf32>
    %30 = arith.addf %28, %29 : vector<2x128xf32>
    %cst_13 = arith.constant 5.000000e-01 : f32
    %31 = vector.broadcast %cst_13 : f32 to vector<2x128xf32>
    %32 = arith.mulf %31, %30 : vector<2x128xf32>
    %33 = vector.extract_strided_slice %32 {offsets = [0, 0], sizes = [2, 32], strides = [1, 1]} : vector<2x128xf32> to vector<2x32xf32>
    %34 = vector.extract_strided_slice %32 {offsets = [0, 96], sizes = [2, 32], strides = [1, 1]} : vector<2x128xf32> to vector<2x32xf32>
    %35 = vector.extract_strided_slice %25 {offsets = [0, 64], sizes = [2, 32], strides = [1, 1]} : vector<2x128xf32> to vector<2x32xf32>
    %36 = math.tanh %35 : vector<2x32xf32>
    %37 = arith.mulf %33, %36 : vector<2x32xf32>
    %38 = math.tanh %37 : vector<2x32xf32>
    %39 = arith.mulf %34, %38 : vector<2x32xf32>
    %40 = arith.truncf %39 : vector<2x32xf32> to vector<2x32xbf16>
    %c0_14 = arith.constant 0 : index
    %c0_15 = arith.constant 0 : index
    %41 = vector.load %arg4[%c0_14, %c0_15] : memref<32x8xbf16, #tpu.memory_space<vmem>>, vector<32x8xbf16>
    %cst_16 = arith.constant dense<0.000000e+00> : vector<2x8xf32>
    %42 = tpu.matmul %40, %41, %cst_16 {dimension_numbers = #tpu.dot_dimension_numbers<[1], [0], [0], [1], [0, 0, 1, 1], [], []>} : vector<2x32xbf16>, vector<32x8xbf16>, vector<2x8xf32> -> vector<2x8xf32>
    %c0_17 = arith.constant 0 : index
    %c0_18 = arith.constant 0 : index
    %43 = vector.load %arg5[%c0_17, %c0_18] : memref<1x8xf32, #tpu.memory_space<vmem>>, vector<1x8xf32>
    %44 = vector.broadcast %43 : vector<1x8xf32> to vector<2x8xf32>
    %45 = arith.addf %42, %44 : vector<2x8xf32>
    %c0_19 = arith.constant 0 : index
    %c0_20 = arith.constant 0 : index
    %46 = vector.load %arg6[%c0_19, %c0_20] : memref<2x8xf32, #tpu.memory_space<vmem>>, vector<2x8xf32>
    tpu.vector_store %arg6[%c0_19, %c0_20], %45 {strides = array<i32>} : memref<2x8xf32, #tpu.memory_space<vmem>>, vector<2x8xf32>,
    return
  }
  func.func @transform_0(%arg0: i32) -> (i32, i32) {
    %c0_i32 = arith.constant 0 : i32
    %c0_i32_0 = arith.constant 0 : i32
    return %arg0, %c0_i32 : i32, i32
  }
  func.func @transform_1(%arg0: i32) -> (i32, i32) {
    %c0_i32 = arith.constant 0 : i32
    %c0_i32_0 = arith.constant 0 : i32
    %c0_i32_1 = arith.constant 0 : i32
    return %c0_i32, %c0_i32_0 : i32, i32
  }
  func.func @transform_2(%arg0: i32) -> (i32, i32) {
    %c0_i32 = arith.constant 0 : i32
    %c0_i32_0 = arith.constant 0 : i32
    %c0_i32_1 = arith.constant 0 : i32
    return %c0_i32, %c0_i32_0 : i32, i32
  }
  func.func @transform_3(%arg0: i32) -> (i32, i32) {
    %c0_i32 = arith.constant 0 : i32
    %c0_i32_0 = arith.constant 0 : i32
    %c0_i32_1 = arith.constant 0 : i32
    return %c0_i32, %c0_i32_0 : i32, i32
  }
  func.func @transform_4(%arg0: i32) -> (i32, i32) {
    %c0_i32 = arith.constant 0 : i32
    %c0_i32_0 = arith.constant 0 : i32
    %c0_i32_1 = arith.constant 0 : i32
    return %c0_i32, %c0_i32_0 : i32, i32
  }
  func.func @transform_5(%arg0: i32) -> (i32, i32) {
    %c0_i32 = arith.constant 0 : i32
    %c0_i32_0 = arith.constant 0 : i32
    return %arg0, %c0_i32 : i32, i32
  }
}

</mosaic_0001>

<bundles_post_ra>
// kernel: tpu_custom_call.1
= control target key start
LH: loop header
LB: loop body
LE: loop exit
PB: predicated region body
PF: predicated region fallthrough
CT: control target
= control target key end

     0   :  { %10 = vsyncpa [#allocation3], 0  ;;  %s494_s0 = inlined_call_operand.vmem [shape: bf16[2,16], index: 0, kind: input, shape index: {}]   ;;  %s495_s1 = inlined_call_operand.hbm [shape: bf16[48,128], index: 1, kind: input, shape index: {}]   ;;  %s496_s2 = inlined_call_operand.vmem [shape: f32[2,128], index: 2, kind: input, shape index: {}]   ;;  %s497_s3 = inlined_call_operand.vmem [shape: bf16[32,8], index: 3, kind: input, shape index: {}]   ;;  %s498_s4 = inlined_call_operand.vmem [shape: f32[1,8], index: 4, kind: input, shape index: {}]   ;;  %s499_s5 = inlined_call_operand.hbm [shape: f32[2,8], index: 5, kind: output, shape index: {}]  }
   0x1   :  { %11 = vsyncpa [#allocation4], 0  ;;  %s396_s18 = smov [#allocation2]   ;;  %s348_s22 = scalar_lea.hbm %s495_s1, 384 }
   0x2   :  { %s19_s19 = sshll.u32 %s396_s18, 4  ;;  %p349_p0 = scmp.ne.s32.totalorder %s495_s1, %s348_s22  ;;  %s20_s19 = int_to_ptr.vmem [resolvable:$true] %s19_s19 }
   0x3   :  { %p352_p1 = scmp.lt.u32.totalorder %s348_s22, %s495_s1 }
   0x5   :  { %p354_p2 = pnand %p352_p1, %p349_p0 }
   0x7   :  { %357 = shalt.err (!%p354_p2)
}
   0x8   :  { %s358_s27 = scalar_lea.vmem %s20_s19, 384  ;;  %p363_p4 = scmp.lt.s32.totalorder %s20_s19, %s20_s19 }
   0x9   :  { %p359_p3 = scmp.ne.s32.totalorder %s20_s19, %s358_s27  ;;  %p364_p5 = scmp.lt.s32.totalorder %s358_s27, %s358_s27 }
   0xb   :  { %p365_p6 = por %p364_p5, %p363_p4 }
   0xd   :  { %p366_p7 = pnand %p365_p6, %p359_p3 }
   0xf   :  { %369 = shalt.err (!%p366_p7)
}
  0x10   :  { %s397_s28 = smov 64   ;;  %s398_s29 = smov 4  }
  0x11   :  { %25 = dma.hbm_to_vmem [thread:$0]  %s495_s1, 384, %s20_s19, [#allocation3], %s397_s28, %s397_s28, %s398_s29  }
  0x12   :  { %392 = dma.done.wait [#allocation3], 384  }
  0x13   :  { %393 = vsyncadd [#allocation3], 4294966912  ;;  %v399_v0 = vmov 0.0   ;;  %vm400_vm0 = vmmov 0   ;;  %v331_v1 = vld [vmem:[#allocation2] sm:$0xff]   ;;  %vm50_vm1 = vcmask 130048  }
  0x14   :  { %301 = vmatprep.subr.bf16.mxu0 %v399_v0  ;;  %303 = vmatprep.mubr.msk.bf16.mxu0 %vm400_vm0, %v399_v0  ;;  %v36_v2 = vld [vmem:[%s494_s0] sm:$0x1]  ;;  %v332_v16 = vld [vmem:[#allocation2 + $0x8] sm:$0xff]   ;;  %v333_v17 = vld [vmem:[#allocation2 + $0x10] sm:$0xff]   ;;  %s401_s0 = smov 96   ;;  %s402_s10 = smov 32  }
  0x15   :  { %307 = vmatprep.subr.bf16.mxu1 %v399_v0  ;;  %311 = vmatprep.mubr.msk.bf16.mxu1 %vm400_vm0, %v399_v0  ;;  %v282_v3 = vld [vmem:[%s496_s2] ss:$0 sm:$0xff]  ;;  %vm135_vm2 = vcmask 261120   ;;  %v285_v23 = vld [vmem:[%s496_s2 + $0x1] ss:$0 sm:$0xff]  ;;  %v335_v37 = vld [vmem:[%s497_s3 + $0x8] sm:$0xff]  }
  0x16   :  { %302 = vmatpush3.bf16.msra.mxu0 %v331_v1  ;;  %308 = vmatpush3.bf16.msra.mxu1 %v332_v16  ;;  %v334_v36 = vld [vmem:[%s497_s3] sm:$0xff]   ;;  %s403_s18 = smov [#allocation5]   ;;  %vm265_vm3 = vcmask 58368  }
  0x17   :  { %315 = vmatprep.subr.bf16.mxu0 %v399_v0  ;;  %309 = vmatprep.subr.bf16.mxu1 %v399_v0  ;;  %v289_v43 = vld [vmem:[%s498_s4] ss:$0 sm:$0xff]  ;;  %s273_s3 = sshll.u32 %s403_s18, 4  ;;  %s274_s3 = int_to_ptr.vmem [resolvable:$true] %s273_s3 }
  0x18   :  { %s370_s19 = scalar_lea.vmem %s274_s3, 32  ;;  %p375_p9 = scmp.lt.s32.totalorder %s274_s3, %s274_s3 }
  0x19   :  { %304 = vmatmul.mubr.msk.bf16.vlgmr.msra.gmra.mrb[0].mxu0 %vm50_vm1, %v36_v2  ;;  %p371_p8 = scmp.ne.s32.totalorder %s274_s3, %s370_s19  ;;  %p376_p10 = scmp.lt.s32.totalorder %s370_s19, %s370_s19 }
  0x1a   :  { %319 = vmatprep.mubr.msk.bf16.mxu0 %vm400_vm0, %v399_v0  ;;  %310 = vmatpush3.bf16.msra.mxu1 %v333_v17 }
  0x1b   :  { %316 = vmatpush3.bf16.msra.mxu0 %v334_v36  ;;  %p377_p11 = por %p376_p10, %p375_p9 }
  0x1c   :  { %317 = vmatprep.subr.bf16.mxu0 %v399_v0 }
  0x1d   :  { %p378_p12 = pnand %p377_p11, %p371_p8 }
  0x1f   :  { %318 = vmatpush3.bf16.msra.mxu0 %v335_v37 }
  0xec   :  { %v88_v4 = vpop.f32.mrb[0].mxu0 }
  0xed   :  { %v89_v5 = vadd.f32 %v282_v3, %v88_v4  ;;  %v305_v6 = vpop.f32.mrb[1].mxu0 }
  0xee   :  { %v91_v7 = vpop.f32.mrb[2].mxu0 }
  0xef   :  { %v306_v8 = vpop.f32.mrb[3].mxu0  ;;  %336 = vtanh.f32 %v89_v5  ;;  %v94_v10 = vmul.f32 0.5, %v89_v5 }
  0xf1   :  { %338 = vtanh.f32 %v94_v10 }
  0xf9   :  { %v337_v9 = vpop.eup %336 }
  0xfa   :  { %100 = vrot.lane.b32.xlu0 %v337_v9, %s397_s28 }
  0xfb   :  { %v339_v11 = vpop.eup %338 }
  0xfc   :  { %v96_v12 = vadd.f32 1.0, %v339_v11 }
  0xfe   :  { %v97_v13 = vmul.f32 0.5, %v96_v12 }
 0x16c   :  { %v101_v14 = vpop.permute.xlu0 %100 }
 0x16d   :  { %v103_v15 = vmul.f32 %v101_v14, %v97_v13 }
 0x16f   :  { %340 = vtanh.f32 %v103_v15 }
 0x179   :  { %v341_v18 = vpop.eup %340 }
 0x17a   :  { %106 = vrot.lane.b32.xlu0 %v341_v18, %s401_s0 }
 0x1ec   :  { %v107_v19 = vpop.permute.xlu0 %106 }
 0x1ed   :  { %v109_v20 = vmul.f32 %v107_v19, %v97_v13 }
 0x1ef   :  { %v110_v21 = vpack.c.bf16 %v109_v20, %v109_v20 }
 0x1f1   :  { %121 = vrot.lane.b32.xlu1 %v110_v21, %s402_s10 }
 0x263   :  { %v122_v22 = vpop.permute.xlu1 %121 }
 0x264   :  { %312 = vmatmul.mubr.msk.bf16.vlgmr.msra.gmra.mrb[0].mxu1 %vm135_vm2, %v122_v22 }
 0x337   :  { %v173_v24 = vpop.f32.mrb[0].mxu1 }
 0x338   :  { %v174_v25 = vadd.f32 %v285_v23, %v173_v24  ;;  %v313_v26 = vpop.f32.mrb[1].mxu1 }
 0x339   :  { %v176_v27 = vpop.f32.mrb[2].mxu1 }
 0x33a   :  { %342 = vtanh.f32 %v174_v25  ;;  %v314_v28 = vpop.f32.mrb[3].mxu1  ;;  %v179_v30 = vmul.f32 0.5, %v174_v25 }
 0x33c   :  { %344 = vtanh.f32 %v179_v30 }
 0x344   :  { %v343_v29 = vpop.eup %342 }
 0x345   :  { %185 = vrot.lane.b32.xlu1 %v343_v29, %s397_s28 }
 0x346   :  { %v345_v31 = vpop.eup %344 }
 0x347   :  { %v181_v32 = vadd.f32 1.0, %v345_v31 }
 0x349   :  { %v182_v33 = vmul.f32 0.5, %v181_v32 }
 0x3b7   :  { %v186_v34 = vpop.permute.xlu1 %185 }
 0x3b8   :  { %v188_v35 = vmul.f32 %v186_v34, %v182_v33 }
 0x3ba   :  { %346 = vtanh.f32 %v188_v35 }
 0x3c4   :  { %v347_v38 = vpop.eup %346 }
 0x3c5   :  { %191 = vrot.lane.b32.xlu0 %v347_v38, %s401_s0 }
 0x437   :  { %v192_v39 = vpop.permute.xlu0 %191 }
 0x438   :  { %v194_v40 = vmul.f32 %v192_v39, %v182_v33 }
 0x43a   :  { %v195_v41 = vpack.c.bf16 %v194_v40, %v194_v40 }
 0x43c   :  { %208 = vrot.lane.b32.xlu1 %v195_v41, %s402_s10 }
 0x4ae   :  { %v209_v42 = vpop.permute.xlu1 %208 }
 0x4af   :  { %320 = vmatmul.mubr.msk.bf16.vlgmr.msra.gmra.mrb[4].mxu0 %vm135_vm2, %v209_v42 }
 0x582   :  { %v259_v44 = vpop.f32.mrb[4].mxu0 }
 0x583   :  { %v260_v45 = vadd.f32 %v289_v43, %v259_v44  ;;  %v321_v46 = vpop.f32.mrb[5].mxu0 }
 0x584   :  { %v262_v47 = vpop.f32.mrb[6].mxu0 }
 0x585   :  { %v322_v48 = vpop.f32.mrb[7].mxu0  ;;  %266 = vst.msk [vmem:[#allocation5] sm:$0x3] %vm265_vm3, %v260_v45 }
 0x586   :  { %381 = shalt.err (!%p378_p12)
}
 0x587   :  { %s382_s4 = scalar_lea.hbm %s499_s5, 32 }
 0x588   :  { %p383_p13 = scmp.ne.s32.totalorder %s499_s5, %s382_s4  ;;  %p386_p0 = scmp.lt.u32.totalorder %s382_s4, %s499_s5 }
 0x58a   :  { %p388_p1 = pnand %p386_p0, %p383_p13 }
 0x58c   :  { %391 = shalt.err (!%p388_p1)
}
 0x58d   :  { %276 = dma.vmem_to_hbm [thread:$0]  %s274_s3, 32, %s499_s5, [#allocation4]  }
 0x58e   :  { %394 = dma.done.wait [#allocation4], 32  }
 0x58f   :  { %395 = vsyncadd [#allocation4], 4294967264 }
 0x590   :  { %280 = vsyncpa [#allocation3], 1 }
 0x591   :  { %281 = vsyncpa [#allocation4], 1 }

</bundles_post_ra>
